<compile_context>
chip_gen: v7x
topology: tpu7x:2x2x1
jax: 0.10.0
libtpu: 0.0.40
codegen_flags: <defaults>
</compile_context>

<pallas_src>
import jax
import jax.numpy as jnp
from jax.experimental import pallas as pl
from jax.experimental.pallas import tpu as pltpu


def _sage_kernel(adj_ref, xwn_ref, xws_ref, rdeg_ref, o_ref):
    """One (dst-row-tile, src-tile) grid step of o += A_tile @ (X @ W_neigh)_tile."""
    k = pl.program_id(1)

    @pl.when(k == 0)
    def _init():
        o_ref[...] = jnp.zeros_like(o_ref)

    # int8 0/1 adjacency upcast to bf16 in-kernel; bf16 x bf16 MXU matmul with
    # f32 accumulation directly into the resident output block.
    o_ref[...] += jnp.dot(adj_ref[...].astype(jnp.bfloat16), xwn_ref[...],
                          preferred_element_type=jnp.float32)

    @pl.when(k == pl.num_programs(1) - 1)
    def _finalize():
        # Mean-normalize (recip_deg == 1 for "sum"), add the hoisted self term
        # (X @ W_self + bias); single lane-dense store.
        o_ref[...] = o_ref[...] * rdeg_ref[...] + xws_ref[...]


def _round_up(x, m):
    return (x + m - 1) // m * m


def _cdiv(a, b):
    return (a + b - 1) // b


def _vmem_capacity_bytes():
    try:
        return int(pltpu.get_tpu_info().vmem_capacity_bytes)
    except Exception:
        return 64 * 1024 * 1024  # conservative fallback (v7x per-TC VMEM)


def cugraph_sage_conv(offsets, indices, feat, weight, bias,
                      aggregator_type="mean", *, tm=1024, tk=2048):
    """JAX/Pallas equivalent of CuGraphSAGEConv.forward (non-block graph).

    offsets: (N+1,) int32 CSC offsets (per-dst-node edge ranges)
    indices: (E,)   int32 CSC source-node indices
    feat:    (N, D_in) float32 node features
    weight:  (D_out, 2*D_in) nn.Linear weight ([W_self | W_neigh])
    bias:    (D_out,)        nn.Linear bias
    """
    N, D_in = feat.shape
    D_out = weight.shape[0]
    E = indices.shape[0]

    if aggregator_type not in ("mean", "sum"):
        # TODO(synk): 'min'/'max' aggregators need a segment-reduce kernel, not a matmul.
        raise NotImplementedError(f"aggregator '{aggregator_type}' not supported here")

    d_pad = _round_up(D_out, 128)          # lane-dense output axis

    # ---- generation-aware tile selection -------------------------------------
    vmem_cap = _vmem_capacity_bytes()
    budget = int(0.45 * vmem_cap)          # tile working-set budget
    vmem_limit = max(24 * 1024 * 1024, min(int(0.6 * vmem_cap), 96 * 1024 * 1024))

    # int8 adjacency sublane packing -> tm multiple of 32; lane axis -> tk % 128,
    # preferably % 256 (v6e/v7x MXU cadence).
    tm = max(32, min(tm, _round_up(N, 32)))
    tm = _round_up(tm, 32)
    tk = max(128, min(tk, _round_up(N, 128)))
    tk = _round_up(tk, 256) if tk >= 256 else _round_up(tk, 128)

    # Keep >= 2 dst-row tiles whenever the problem allows: the "parallel" row axis
    # is what shards across the two v7x TensorCores (single tile would serialize).
    while tm >= 64 and _cdiv(N, tm) < 2 and N > 32:
        tm = max(32, _round_up(tm // 2, 32))

    def _ws_bytes(tm_, tk_):
        # Double-buffered input blocks + f32 output block (+ lane-padded 1/deg).
        return (2 * tm_ * tk_ * 1            # adjacency, int8
                + 2 * tk_ * d_pad * 2        # X @ W_neigh, bf16
                + 2 * tm_ * d_pad * 4        # X @ W_self + b, f32
                + 2 * tm_ * 128 * 4          # 1/deg, lane-padded f32
                + 2 * tm_ * d_pad * 4)       # output block, f32

    while _ws_bytes(tm, tk) > budget and tk > 256:
        tk = max(256, _round_up(tk // 2, 256))
    while _ws_bytes(tm, tk) > budget and tm > 64:
        tm = max(64, _round_up(tm // 2, 32))

    assert tm % 32 == 0 and tk % 128 == 0
    n_rows = _round_up(N, tm)              # padded dst axis
    n_cols = _round_up(N, tk)              # padded src axis

    # ---- glue in plain JAX: CSC graph -> dense 0/1 int8 adjacency + projections ----
    # NOTE: feat_drop == 0.0 in the reference module default -> dropout is identity.
    deg = (offsets[1:] - offsets[:-1]).astype(jnp.int32)
    dst_per_edge = jnp.repeat(jnp.arange(N, dtype=jnp.int32), deg,
                              total_repeat_length=E)
    # Unnormalized adjacency built directly in its 1-byte streaming dtype (0/1 and
    # small multigraph counts <= 127 are exact).
    # TODO(synk): for truly sparse graphs replace the dense A @ (X@W) path with a
    #   scalar-prefetch gather / segment-sum kernel (offsets/indices in SMEM + manual DMA).
    adj = (jnp.zeros((n_rows, n_cols), jnp.int8)
           .at[dst_per_edge, indices].add(jnp.int8(1)))

    # Fused projection: feat @ [W_self | W_neigh] in one (D_in x 2*d_pad) matmul.
    w_cat = jnp.zeros((D_in, 2 * d_pad), jnp.float32)
    w_cat = w_cat.at[:, :D_out].set(weight[:, :D_in].T)               # W_self
    w_cat = w_cat.at[:, d_pad:d_pad + D_out].set(weight[:, D_in:].T)  # W_neigh
    bias_p = jnp.zeros((d_pad,), jnp.float32).at[:D_out].set(bias)

    xw = jnp.dot(feat.astype(jnp.float32), w_cat,
                 preferred_element_type=jnp.float32)
    xw_self = xw[:, :d_pad] + bias_p[None, :]
    xw_neigh = xw[:, d_pad:]

    xw_self = jnp.pad(xw_self, ((0, n_rows - N), (0, 0)))                       # f32
    # Projected neighbor features streamed in bf16 (their re-stream traffic is
    # ~d_pad/tm of the adjacency bytes at these tile sizes).
    xw_neigh = jnp.pad(xw_neigh, ((0, n_cols - N), (0, 0))).astype(jnp.bfloat16)

    if aggregator_type == "mean":
        recip = 1.0 / jnp.maximum(deg.astype(jnp.float32), 1.0)
    else:  # "sum"
        recip = jnp.ones((N,), jnp.float32)
    recip = jnp.pad(recip, (0, n_rows - N)).reshape(n_rows, 1)

    grid = (n_rows // tm, n_cols // tk)

    out_p = pl.pallas_call(
        _sage_kernel,
        out_shape=jax.ShapeDtypeStruct((n_rows, d_pad), jnp.float32),
        grid_spec=pltpu.PrefetchScalarGridSpec(
            num_scalar_prefetch=0,
            grid=grid,
            in_specs=[
                pl.BlockSpec((tm, tk), lambda i, k: (i, k)),       # A (int8, 0/1)
                pl.BlockSpec((tk, d_pad), lambda i, k: (k, 0)),    # X @ W_neigh (bf16)
                pl.BlockSpec((tm, d_pad), lambda i, k: (i, 0)),    # X @ W_self + b (f32)
                pl.BlockSpec((tm, 1), lambda i, k: (i, 0)),        # 1/deg (f32)
            ],
            out_specs=pl.BlockSpec((tm, d_pad), lambda i, k: (i, 0)),
        ),
        compiler_params=pltpu.CompilerParams(
            dimension_semantics=("parallel", "arbitrary"),
            vmem_limit_bytes=vmem_limit,
        ),
    )(adj, xw_neigh, xw_self, recip)

    return out_p[:N, :D_out].astype(feat.dtype)


def _reference(offsets, indices, feat, weight, bias, aggregator_type="mean"):
    """Pure-JAX f32 reference for correctness checking."""
    N, D_in = feat.shape
    E = indices.shape[0]
    deg = (offsets[1:] - offsets[:-1]).astype(jnp.int32)
    dst_per_edge = jnp.repeat(jnp.arange(N, dtype=jnp.int32), deg,
                              total_repeat_length=E)
    adj = jnp.zeros((N, N), jnp.float32).at[dst_per_edge, indices].add(1.0)
    agg = adj @ feat
    if aggregator_type == "mean":
        agg = agg / jnp.maximum(deg.astype(jnp.float32), 1.0)[:, None]
    h = jnp.concatenate([feat, agg], axis=1)
    return h @ weight.T + bias[None, :]


if __name__ == "__main__":
    key = jax.random.PRNGKey(0)
    k_graph, k_feat, k_w, k_b = jax.random.split(key, 4)

    N, D_in, D_out = 320, 32, 16

    # Deterministic random graph with self-loops, encoded as CSC.
    mask = jax.random.bernoulli(k_graph, 0.05, (N, N)) | jnp.eye(N, dtype=bool)
    deg = mask.sum(axis=1).astype(jnp.int32)
    offsets = jnp.concatenate(
        [jnp.zeros((1,), jnp.int32), jnp.cumsum(deg).astype(jnp.int32)]
    )
    _, src_idx = jnp.nonzero(mask)        # row-major => grouped by dst, matches CSC
    indices = src_idx.astype(jnp.int32)

    feat = jax.random.normal(k_feat, (N, D_in), jnp.float32)

    # nn.Linear(2*D_in, D_out) default-style init: U(-1/sqrt(fan_in), 1/sqrt(fan_in))
    bound = 1.0 / jnp.sqrt(2.0 * D_in)
    weight = jax.random.uniform(k_w, (D_out, 2 * D_in), jnp.float32, -bound, bound)
    bias = jax.random.uniform(k_b, (D_out,), jnp.float32, -bound, bound)

    for aggr in ("mean", "sum"):
        ref = _reference(offsets, indices, feat, weight, bias, aggr)

        # Small explicit tiles: tm=128 (mult. of 32), tk=256 -> 3x2 grid at N=320,
        # exercising both the parallel row axis and the k-reduction in-output
        # accumulator pattern.
        out = cugraph_sage_conv(offsets, indices, feat, weight, bias, aggr,
                                tm=128, tk=256)
        out = jax.block_until_ready(out)
        assert out.shape == (N, D_out)
        err = float(jnp.max(jnp.abs(out - ref)))
        # bf16 streaming of projected neighbor features -> bf16-level tolerance.
        assert jnp.allclose(out, ref, atol=2e-2, rtol=2e-2), (aggr, "small-tile", err)

        # Default (large) tiles: auto-clamped to the problem, >=2 row tiles kept.
        out2 = cugraph_sage_conv(offsets, indices, feat, weight, bias, aggr)
        out2 = jax.block_until_ready(out2)
        err2 = float(jnp.max(jnp.abs(out2 - ref)))
        assert jnp.allclose(out2, ref, atol=2e-2, rtol=2e-2), (aggr, "default-tile", err2)

    print("KERNEL_OK")
</pallas_src>

<mosaic_0001>
module attributes {stable_mosaic.version = 11 : i64} {
  func.func @_sage_kernel(%arg0: i32, %arg1: i32, %arg2: memref<128x256xi8, #tpu.memory_space<vmem>>, %arg3: memref<256x128xbf16, #tpu.memory_space<vmem>>, %arg4: memref<128x128xf32, #tpu.memory_space<vmem>>, %arg5: memref<128x1xf32, #tpu.memory_space<vmem>>, %arg6: memref<128x128xf32, #tpu.memory_space<vmem>>) attributes {dimension_semantics = [#tpu.dimension_semantics<parallel>, #tpu.dimension_semantics<arbitrary>], iteration_bounds = array<i64: 3, 2>, scalar_prefetch = 0 : i64, scratch_operands = 0 : i64, tpu.core_type = #tpu.core_type<tc>, window_params = [{transform_indices = @transform_0, window_bounds = array<i64: 128, 256>}, {transform_indices = @transform_1, window_bounds = array<i64: 256, 128>}, {transform_indices = @transform_2, window_bounds = array<i64: 128, 128>}, {transform_indices = @transform_3, window_bounds = array<i64: 128, 1>}, {transform_indices = @transform_4, window_bounds = array<i64: 128, 128>}]} {
    %c0_i32 = arith.constant 0 : i32
    %0 = arith.cmpi eq, %arg1, %c0_i32 : i32
    %1 = arith.extui %0 : i1 to i32
    %c0_i32_0 = arith.constant 0 : i32
    %2 = arith.cmpi ne, %1, %c0_i32_0 : i32
    scf.if %2 {
      %cst_9 = arith.constant 0.000000e+00 : f32
      %13 = vector.broadcast %cst_9 : f32 to vector<128x128xf32>
      %c0_10 = arith.constant 0 : index
      %c0_11 = arith.constant 0 : index
      %14 = vector.load %arg6[%c0_10, %c0_11] : memref<128x128xf32, #tpu.memory_space<vmem>>, vector<128x128xf32>
      tpu.vector_store %arg6[%c0_10, %c0_11], %13 {strides = array<i32>} : memref<128x128xf32, #tpu.memory_space<vmem>>, vector<128x128xf32>,
    } else {
    }
    %c0 = arith.constant 0 : index
    %c0_1 = arith.constant 0 : index
    %3 = vector.load %arg6[%c0, %c0_1] : memref<128x128xf32, #tpu.memory_space<vmem>>, vector<128x128xf32>
    %c0_2 = arith.constant 0 : index
    %c0_3 = arith.constant 0 : index
    %4 = vector.load %arg2[%c0_2, %c0_3] : memref<128x256xi8, #tpu.memory_space<vmem>>, vector<128x256xi8>
    %5 = arith.sitofp %4 : vector<128x256xi8> to vector<128x256xbf16>
    %c0_4 = arith.constant 0 : index
    %c0_5 = arith.constant 0 : index
    %6 = vector.load %arg3[%c0_4, %c0_5] : memref<256x128xbf16, #tpu.memory_space<vmem>>, vector<256x128xbf16>
    %cst = arith.constant dense<0.000000e+00> : vector<128x128xf32>
    %7 = tpu.matmul %5, %6, %cst {dimension_numbers = #tpu.dot_dimension_numbers<[1], [0], [0], [1], [0, 0, 1, 1], [], []>} : vector<128x256xbf16>, vector<256x128xbf16>, vector<128x128xf32> -> vector<128x128xf32>
    %8 = arith.addf %3, %7 : vector<128x128xf32>
    %c0_6 = arith.constant 0 : index
    %c0_7 = arith.constant 0 : index
    %9 = vector.load %arg6[%c0_6, %c0_7] : memref<128x128xf32, #tpu.memory_space<vmem>>, vector<128x128xf32>
    tpu.vector_store %arg6[%c0_6, %c0_7], %8 {strides = array<i32>} : memref<128x128xf32, #tpu.memory_space<vmem>>, vector<128x128xf32>,
    %c1_i32 = arith.constant 1 : i32
    %10 = arith.cmpi eq, %arg1, %c1_i32 : i32
    %11 = arith.extui %10 : i1 to i32
    %c0_i32_8 = arith.constant 0 : i32
    %12 = arith.cmpi ne, %11, %c0_i32_8 : i32
    scf.if %12 {
      %c0_9 = arith.constant 0 : index
      %c0_10 = arith.constant 0 : index
      %13 = vector.load %arg6[%c0_9, %c0_10] : memref<128x128xf32, #tpu.memory_space<vmem>>, vector<128x128xf32>
      %c0_11 = arith.constant 0 : index
      %c0_12 = arith.constant 0 : index
      %14 = vector.load %arg5[%c0_11, %c0_12] : memref<128x1xf32, #tpu.memory_space<vmem>>, vector<128x1xf32>
      %15 = vector.broadcast %14 : vector<128x1xf32> to vector<128x128xf32>
      %16 = arith.mulf %13, %15 : vector<128x128xf32>
      %c0_13 = arith.constant 0 : index
      %c0_14 = arith.constant 0 : index
      %17 = vector.load %arg4[%c0_13, %c0_14] : memref<128x128xf32, #tpu.memory_space<vmem>>, vector<128x128xf32>
      %18 = arith.addf %16, %17 : vector<128x128xf32>
      %c0_15 = arith.constant 0 : index
      %c0_16 = arith.constant 0 : index
      %19 = vector.load %arg6[%c0_15, %c0_16] : memref<128x128xf32, #tpu.memory_space<vmem>>, vector<128x128xf32>
      tpu.vector_store %arg6[%c0_15, %c0_16], %18 {strides = array<i32>} : memref<128x128xf32, #tpu.memory_space<vmem>>, vector<128x128xf32>,
    } else {
    }
    return
  }
  func.func @transform_0(%arg0: i32, %arg1: i32) -> (i32, i32) {
    %c0_i32 = arith.constant 0 : i32
    return %arg0, %arg1 : i32, i32
  }
  func.func @transform_1(%arg0: i32, %arg1: i32) -> (i32, i32) {
    %c0_i32 = arith.constant 0 : i32
    %c0_i32_0 = arith.constant 0 : i32
    return %arg1, %c0_i32 : i32, i32
  }
  func.func @transform_2(%arg0: i32, %arg1: i32) -> (i32, i32) {
    %c0_i32 = arith.constant 0 : i32
    %c0_i32_0 = arith.constant 0 : i32
    return %arg0, %c0_i32 : i32, i32
  }
  func.func @transform_3(%arg0: i32, %arg1: i32) -> (i32, i32) {
    %c0_i32 = arith.constant 0 : i32
    %c0_i32_0 = arith.constant 0 : i32
    return %arg0, %c0_i32 : i32, i32
  }
  func.func @transform_4(%arg0: i32, %arg1: i32) -> (i32, i32) {
    %c0_i32 = arith.constant 0 : i32
    %c0_i32_0 = arith.constant 0 : i32
    return %arg0, %c0_i32 : i32, i32
  }
}

</mosaic_0001>

<bundles_post_ra>
// kernel: tpu_custom_call.1
= control target key start
LH: loop header
LB: loop body
LE: loop exit
PB: predicated region body
PF: predicated region fallthrough
CT: control target
= control target key end

     0   :  { %s1979_s0 = inlined_call_operand.vmem [shape: s8[384,512], index: 0, kind: input, shape index: {}]   ;;  %s1980_s1 = inlined_call_operand.hbm [shape: bf16[512,128], index: 1, kind: input, shape index: {}]   ;;  %s1981_s2 = inlined_call_operand.hbm [shape: f32[384,128], index: 2, kind: input, shape index: {}]   ;;  %s1982_s3 = inlined_call_operand.vmem [shape: f32[384,1], index: 3, kind: input, shape index: {}]   ;;  %s1983_s4 = inlined_call_operand.hbm [shape: f32[384,128], index: 4, kind: output, shape index: {}]  }
   0x1   :  { %1993 = sst [smem:[#allocation20_spill]] %s1979_s0 }
   0x2   :  { %1994 = sst [smem:[#allocation21_spill]] %s1980_s1 }
   0x3   :  { %1995 = sst [smem:[#allocation22_spill]] %s1983_s4 }
   0x4   :  { %9 = vsyncpa [#allocation4], 0 }
   0x5   :  { %11 = vsyncpa [#allocation4 + $0x1], 0 }
   0x6   :  { %12 = vsyncpa [#allocation7], 0 }
   0x7   :  { %14 = vsyncpa [#allocation7 + $0x1], 0 }
   0x8   :  { %15 = vsyncpa [#allocation5], 0 }
   0x9   :  { %17 = vsyncpa [#allocation5 + $0x1], 0  ;;  %s1512_s15 = smov 0   ;;  %s1514_s16 = smov 0  }
   0xa   :  { %s1516_s17 = smov 0   ;;  %s1518_s18 = smov 0  }
   0xb   :  { %s1520_s19 = smov 0   ;;  %s1522_s20 = smov 0  }
   0xc   :  { %s1524_s21 = smov 0   ;;  %s1526_s22 = smov 0  }
   0xd   :  { %s1528_s23 = smov 0   ;;  %s1530_s24 = smov 0  }
   0xe   :  { %s1532_s25 = smov 0   ;;  %s1534_s26 = smov 0  }
   0xf   :  { %s1536_s27 = smov 0  }
  0x10 LB: > { %1996 = sst [smem:[#allocation12_spill]] %s1426_s15  ;;  %s1006_s28 = sadd.s32 4294967295, %s1474_s27   ;;  %s1474_s27 = sphi %s1536_s27, %s23_s27   ;;  %s1470_s26 = sphi %s1534_s26, %s2037_s26   ;;  %s1466_s25 = sphi %s1532_s25, %s2026_s25   ;;  %s1462_s24 = sphi %s1530_s24, %s2036_s24   ;;  %s1458_s23 = sphi %s1528_s23, %s2025_s23   ;;  %s1454_s22 = sphi %s1526_s22, %s2035_s22   ;;  %s1450_s21 = sphi %s1524_s21, %s2034_s21   ;;  %s1446_s20 = sphi %s1522_s20, %s2033_s20   ;;  %s1442_s19 = sphi %s1520_s19, %s2032_s19   ;;  %s1438_s18 = sphi %s1518_s18, %s2031_s18   ;;  %s1434_s17 = sphi %s1516_s17, %s2030_s17   ;;  %s1430_s16 = sphi %s1514_s16, %s2029_s16   ;;  %s1426_s15 = sphi %s1512_s15, %s2028_s15  }
  0x11   : > { %1997 = sst [smem:[#allocation13_spill]] %s1466_s25  ;;  %s32_s30 = sadd.s32 1, %s1466_s25 }
  0x12   : > { %s35_s5 = sadd.s32 1, %s1470_s26  ;;  %p33_p0 = scmp.ge.s32.totalorder %s32_s30, 2 }
  0x13   : > { %s44_s6 = sadd.s32 1, %s1454_s22  ;;  %p51_p1 = scmp.ne.s32.totalorder %s1454_s22, %s1450_s21 }
  0x14   : > { %p52_p2 = scmp.eq.s32.totalorder %s1474_s27, 0  ;;  %s2039_s30 = smov (%p33_p0, %s32_s30), 0 }
  0x15   : > { %1998 = sst [smem:[#allocation14_spill]] %s2039_s30  ;;  %s2041_s5 = smov (!%p33_p0, %s35_s5), %s1470_s26 }
  0x16   : > { %s40_s7 = ssub.s32 %s1466_s25, %s2039_s30  ;;  %p1592_p3 = por %p52_p2, %p51_p1 }
  0x17   : > { %p37_p4 = scmp.ge.s32.totalorder %s2041_s5, 3  ;;  %p68_p5 = scmp.eq.s32.totalorder %s40_s7, 0 }
  0x18   : > { %s70_s9 = sadd.s32 1, %s1446_s20  ;;  %p77_p6 = scmp.ne.s32.totalorder %s1446_s20, %s1442_s19 }
  0x19   : > { %s2043_s5 = smov (%p37_p4, %s2041_s5), 0  ;;  %p83_p8 = scmp.ne.s32.totalorder %s1442_s19, %s1438_s18 }
  0x1a   : > { %2000 = sst [smem:[#allocation15_spill]] %s2043_s5  ;;  %s39_s11 = ssub.s32 %s1470_s26, %s2043_s5 }
  0x1b   : > { %s1602_s10 = scalar_select %p68_p5, %s1446_s20, %s70_s9  }
  0x1c   : > { %p1608_p7 = por %p77_p6, %p52_p2  ;;  %s41_s13 = sor.u32 %s40_s7, %s39_s11 }
  0x1d   : > { %2001 = sst [smem:[#allocation16_spill]] %s1602_s10  ;;  %p42_p9 = scmp.eq.s32.totalorder %s41_s13, 0 }
  0x1e   : > { %p84_p10 = scmp.eq.s32.totalorder %s1006_s28, 0  ;;  %p94_p11 = scmp.eq.s32.totalorder %s39_s11, 0 }
  0x1f   : > { %s96_s14 = sadd.s32 1, %s1434_s17  ;;  %p103_p13 = scmp.ne.s32.totalorder %s1434_s17, %s1430_s16 }
  0x20   : > { %s1618_s29 = scalar_select %p42_p9, %s1454_s22, %s44_s6  }
  0x21   : > { %p1620_p12 = por %p84_p10, %p83_p8  ;;  %p1631_p0 = por %p103_p13, %p52_p2 }
  0x22   : > { %2003 = sst [smem:[#allocation17_spill]] %s1618_s29  ;;  %p109_p1 = scmp.ne.s32.totalorder %s1430_s16, %s1426_s15 }
  0x23   : > { %s2004_s30 = scalar_select %p1620_p12, 1, 0 }
  0x24   : > { %s1627_s9 = scalar_select %p94_p11, %s1434_s17, %s96_s14  }
  0x25   : > { %p159_p4 = scmp.eq.s32.totalorder %s1006_s28, 5  ;;  %s2007_s18 = sadd.s32 4294967294, %s1474_s27  }
  0x26   : > { %2005 = sst [smem:[#allocation18_spill]] %s1627_s9  ;;  %p165_p5 = scmp.eq.s32.totalorder %s2007_s18, 5 }
  0x27   : > { %p1641_p6 = por %p109_p1, %p84_p10  ;;  %p1645_p8 = por %p159_p4, %p103_p13 }
  0x28   : > { %p1649_p9 = por %p165_p5, %p109_p1  ;;  %p1009_p2 = scmp.ge.s32.totalorder %s1474_s27, 6 }
  0x29   : > { %s2008_s6 = scalar_select %p1641_p6, 1, 0 }
  0x2a   : > { %s2009_s7 = scalar_select %p1645_p8, 1, 0 }
  0x2b   : > { %s2010_s11 = scalar_select %p1649_p9, 1, 0 }
  0x2c   : > { %181 = sbr.rel (%p1009_p2) target bundleno = 121 (0x79), region = 16 }
  0x2d   : > { %2011 = sst [smem:[#allocation19_spill]] %s2010_s11 }
  0x33   : > { %184 = sbr.rel (!%p1592_p3) target bundleno = 65 (0x41), region = 20  ;;  %s186_s28 = sand.u32 (%p1592_p3), 1, %s1454_s22  }
  0x34   : > { %s1012_s13 = sshll.u32 (%p1592_p3), %s1466_s25, 1  ;;  %s1010_s14 = sshll.u32 (%p1592_p3), %s186_s28, 6 }
  0x35   : > { %s1051_s18 = sshll.u32 (%p1592_p3), %s1470_s26, 4  ;;  %s2012_s0 = sld [smem:[#allocation20_spill]] (%p1592_p3) }
  0x36   : > { %s192_s29 = sadd.s32 (%p1592_p3), %s1051_s18, %s1012_s13  ;;  %s188_s11 = scalar_lea.vmem (%p1592_p3), [#allocation2], %s1010_s14 }
  0x37   : > { %s1014_s10 = sshll.u32 (%p1592_p3), %s192_s29, 3 }
  0x3b   : > { %s194_s4 = scalar_lea.vmem %s2012_s0, %s1014_s10 }
  0x3c   : > { %v207_v0 = vld [vmem:[%s194_s4] sm:$0xff]  ;;  %v209_v1 = vld [vmem:[%s194_s4 + $0x8] sm:$0xff] }
  0x3d   : > { %v211_v2 = vld [vmem:[%s194_s4 + $0x20] sm:$0xff]  ;;  %208 = vst [vmem:[%s188_s11] sm:$0xff] %v207_v0  ;;  %210 = vst [vmem:[%s188_s11 + $0x8] sm:$0xff] %v209_v1  ;;  %v213_v3 = vld [vmem:[%s194_s4 + $0x28] sm:$0xff] }
  0x3e   : > { %212 = vst [vmem:[%s188_s11 + $0x10] sm:$0xff] %v211_v2  ;;  %v215_v4 = vld [vmem:[%s194_s4 + $0x40] sm:$0xff]  ;;  %v217_v5 = vld [vmem:[%s194_s4 + $0x48] sm:$0xff]  ;;  %214 = vst [vmem:[%s188_s11 + $0x18] sm:$0xff] %v213_v3 }
  0x3f   : > { %216 = vst [vmem:[%s188_s11 + $0x20] sm:$0xff] %v215_v4  ;;  %218 = vst [vmem:[%s188_s11 + $0x28] sm:$0xff] %v217_v5  ;;  %v219_v6 = vld [vmem:[%s194_s4 + $0x60] sm:$0xff]  ;;  %v221_v7 = vld [vmem:[%s194_s4 + $0x68] sm:$0xff] }
  0x40   : > { %220 = vst [vmem:[%s188_s11 + $0x30] sm:$0xff] %v219_v6  ;;  %222 = vst [vmem:[%s188_s11 + $0x38] sm:$0xff] %v221_v7 }
  0x41 PF: > { %s229_s15 = sand.u32 1, %s1446_s20   ;;  %s1052_s29 = sshll.u32 %s1466_s25, 11 }
  0x42   : > { %s1015_s8 = sshll.u32 %s229_s15, 7  ;;  %s2013_s1 = sld [smem:[#allocation21_spill]] }
  0x43   : > { %s233_s13 = scalar_lea.vmem [#allocation3], %s1015_s8  ;;  %s1671_s11 = scalar_lea.sflag [#allocation4], %s229_s15 }
  0x44   : > { %s240_s4 = sshll.u32 %s233_s13, 4  ;;  %s1669_s4 = int_to_ptr.vmem [resolvable:$true] %s240_s4 }
  0x48   : > { %s1667_s28 = scalar_lea.hbm %s2013_s1, %s1052_s29  ;;  %s1280_s29 = scalar_lea.hbm %s2013_s1, 4096 }
  0x49   : > { %s1276_s14 = scalar_lea.hbm %s1667_s28, 2048  ;;  %p1281_p13 = scmp.lt.u32.totalorder %s1667_s28, %s2013_s1 }
  0x4a   : > { %p1277_p3 = scmp.ne.s32.totalorder %s1667_s28, %s1276_s14  ;;  %p1282_p1 = scmp.lt.u32.totalorder %s1280_s29, %s1276_s14 }
  0x4b   : > { %p1284_p5 = scmp.lt.u32.totalorder %s1276_s14, %s1667_s28 }
  0x4c   : > { %p1278_p10 = pnand %p1277_p3, %p1608_p7  ;;  %p1283_p4 = por %p1282_p1, %p1281_p13 }
  0x4e   : > { %p1279_p11 = pneg %p1278_p10  ;;  %p1285_p2 = por %p1284_p5, %p1283_p4 }
  0x50   : > { %p1286_p9 = pnand %p1285_p2, %p1279_p11 }
  0x52   : > { %1289 = shalt.err (!%p1286_p9)
}
  0x53   : > { %s1290_s15 = scalar_lea.vmem %s1669_s4, 2048  ;;  %s1476_s0 = smov [#allocation3]  }
  0x54   : > { %p1291_p3 = scmp.ne.s32.totalorder %s1669_s4, %s1290_s15  ;;  %s1294_s8 = sshll.u32 %s1476_s0, 4  ;;  %s1295_s8 = int_to_ptr.vmem [resolvable:$false] %s1294_s8 }
  0x55   : > { %s1296_s13 = scalar_lea.vmem %s1295_s8, 4096  ;;  %p1297_p6 = scmp.lt.s32.totalorder %s1669_s4, %s1295_s8 }
  0x56   : > { %p1292_p10 = pnand %p1291_p3, %p1608_p7  ;;  %p1298_p12 = scmp.lt.s32.totalorder %s1296_s13, %s1290_s15 }
  0x58   : > { %p1293_p8 = pneg %p1292_p10  ;;  %p1299_p13 = por %p1298_p12, %p1297_p6 }
  0x5a   : > { %p1300_p1 = pnand %p1299_p13, %p1293_p8 }
  0x5c   : > { %1303 = shalt.err (!%p1300_p1)
}
  0x5d   : > { %s1477_s14 = smov 64   ;;  %s1478_s18 = smov 4  }
  0x5e   : > { %1135 = dma.hbm_to_vmem [thread:$0]  (%p1608_p7), %s1667_s28, 2048, %s1669_s4, %s1671_s11, %s1477_s14, %s1477_s14, %s1478_s18  }
  0x5f   : > { %s250_s29 = sand.u32 1, %s1434_s17   ;;  %s1053_s10 = sshll.u32 %s1470_s26, 11 }
  0x60   : > { %s1018_s9 = sshll.u32 %s250_s29, 7  ;;  %s1700_s15 = scalar_lea.hbm %s1981_s2, %s1053_s10 }
  0x61   : > { %s254_s13 = scalar_lea.vmem [#allocation6], %s1018_s9  ;;  %s1704_s25 = scalar_lea.sflag [#allocation7], %s250_s29 }
  0x62   : > { %s261_s1 = sshll.u32 %s254_s13, 4  ;;  %s1304_s12 = scalar_lea.hbm %s1700_s15, 2048  ;;  %s1702_s1 = int_to_ptr.vmem [resolvable:$true] %s261_s1 }
  0x63   : > { %p1305_p7 = scmp.ne.s32.totalorder %s1700_s15, %s1304_s12  ;;  %s1308_s11 = scalar_lea.hbm %s1981_s2, 6144 }
  0x64   : > { %p1309_p8 = scmp.lt.u32.totalorder %s1700_s15, %s1981_s2  ;;  %p1310_p9 = scmp.lt.u32.totalorder %s1308_s11, %s1304_s12 }
  0x65   : > { %p1306_p12 = pnand %p1305_p7, %p1631_p0  ;;  %p1312_p4 = scmp.lt.u32.totalorder %s1304_s12, %s1700_s15 }
  0x66   : > { %p1311_p11 = por %p1310_p9, %p1309_p8 }
  0x67   : > { %p1307_p6 = pneg %p1306_p12 }
  0x68   : > { %p1313_p5 = por %p1312_p4, %p1311_p11 }
  0x6a   : > { %p1314_p2 = pnand %p1313_p5, %p1307_p6 }
  0x6c   : > { %1317 = shalt.err (!%p1314_p2)
}
  0x6d   : > { %s1318_s29 = scalar_lea.vmem %s1702_s1, 2048  ;;  %s1479_s10 = smov [#allocation6]  }
  0x6e   : > { %p1319_p3 = scmp.ne.s32.totalorder %s1702_s1, %s1318_s29  ;;  %s1322_s9 = sshll.u32 %s1479_s10, 4  ;;  %s1323_s9 = int_to_ptr.vmem [resolvable:$false] %s1322_s9 }
  0x6f   : > { %s1324_s0 = scalar_lea.vmem %s1323_s9, 4096  ;;  %p1325_p1 = scmp.lt.s32.totalorder %s1702_s1, %s1323_s9 }
  0x70   : > { %p1320_p10 = pnand %p1319_p3, %p1631_p0  ;;  %p1326_p7 = scmp.lt.s32.totalorder %s1324_s0, %s1318_s29 }
  0x72   : > { %p1321_p13 = pneg %p1320_p10  ;;  %p1327_p12 = por %p1326_p7, %p1325_p1 }
  0x74   : > { %p1328_p8 = pnand %p1327_p12, %p1321_p13 }
  0x76   : > { %1331 = shalt.err (!%p1328_p8)
}
  0x77   : > { %s1480_s8 = smov 128   ;;  %s1481_s13 = smov 8  }
  0x78   : > { %1136 = dma.hbm_to_vmem [thread:$0]  (%p1631_p0), %s1700_s15, 2048, %s1702_s1, %s1704_s25, %s1480_s8, %s1480_s8, %s1481_s13  }
  0x79 PF: > { %p1021_p6 = scmp.ge.s32.totalorder %s1474_s27, 1  ;;  %p278_p9 = scmp.lt.s32.totalorder %s1474_s27, 7 }
  0x7b   : > { %p279_p11 = pnand %p1021_p6, %p278_p9 }
  0x7c   : > { %s285_s12 = sand.u32 (!%p279_p11), 1, %s1450_s21   ;;  %s291_s28 = sand.u32 (!%p279_p11), 1, %s1442_s19  }
  0x7d   : > { %282 = sbr.rel (%p279_p11) target bundleno = 591 (0x24f), region = 55  ;;  %s1022_s4 = sshll.u32 (!%p279_p11), %s285_s12, 6 }
  0x7e   : > { %s1023_s11 = sshll.u32 (!%p279_p11), %s291_s28, 7  ;;  %s1732_s14 = scalar_lea.vmem (!%p279_p11), [#allocation2], %s1022_s4 }
  0x7f   : > { %s292_s18 = scalar_lea.sflag (!%p279_p11), [#allocation4], %s291_s28  ;;  %s1734_s29 = scalar_lea.vmem (!%p279_p11), [#allocation3], %s1023_s11 }
  0x80   : > { %p2014_p0 = scmp.ne.s32.totalorder (!%p279_p11), %s2004_s30, 0 }
  0x84   : > { %1413 = dma.done.wait (%p2014_p0), %s292_s18, 2048  }
  0x85   : > { %1415 = vsyncadd (%p2014_p0), %s292_s18, 4294965248  ;;  %s1741_s1 = sand.u32 1, %s1430_s16   ;;  %p2015_p4 = scmp.ne.s32.totalorder %s2008_s6, 0 }
  0x86   : > { %s1024_s21 = sshll.u32 %s1741_s1, 7  ;;  %s301_s25 = scalar_lea.sflag [#allocation7], %s1741_s1 }
  0x87   : > { %s1745_s5 = scalar_lea.vmem [#allocation6], %s1024_s21 }
  0x88   : > { %1417 = dma.done.wait (%p2015_p4), %s301_s25, 2048  }
  0x89   : > { %1419 = vsyncadd (%p2015_p4), %s301_s25, 4294965248  ;;  %s1026_s15 = sshll.u32 %s1462_s24, 4  ;;  %s1757_s8 = scalar_lea.vmem [#allocation8], %s1024_s21 }
  0x8a   : > { %p348_p5 = scmp.lt.s32.totalorder %s1026_s15, 47  ;;  %p1028_p2 = scmp.ne.s32.totalorder %s1458_s23, 0 }
  0x8b   : > { %v1482_v8 = vmov (!%p1028_p2), 0.0  }
  0x8c   : > { %s2045_s15 = smov (!%p348_p5, %s1026_s15), 47  ;;  %358 = sbr.rel (%p1028_p2) target bundleno = 149 (0x95), region = 71 }
  0x8d   : > { %s1027_s30 = sshll.u32 %s2045_s15, 3  ;;  %359 = vst [vmem:[%s1757_s8] sm:$0xff] (!%p1028_p2), %v1482_v8  ;;  %360 = vst [vmem:[%s1757_s8 + $0x8] sm:$0xff] (!%p1028_p2), %v1482_v8 }
  0x8e   : > { %s1755_s0 = scalar_lea.vmem %s1982_s3, %s1027_s30  ;;  %361 = vst [vmem:[%s1757_s8 + $0x10] sm:$0xff] (!%p1028_p2), %v1482_v8  ;;  %362 = vst [vmem:[%s1757_s8 + $0x18] sm:$0xff] (!%p1028_p2), %v1482_v8 }
  0x8f   : > { %363 = vst [vmem:[%s1757_s8 + $0x20] sm:$0xff] (!%p1028_p2), %v1482_v8  ;;  %364 = vst [vmem:[%s1757_s8 + $0x28] sm:$0xff] (!%p1028_p2), %v1482_v8 }
  0x90   : > { %365 = vst [vmem:[%s1757_s8 + $0x30] sm:$0xff] (!%p1028_p2), %v1482_v8  ;;  %366 = vst [vmem:[%s1757_s8 + $0x38] sm:$0xff] (!%p1028_p2), %v1482_v8 }
  0x91   : > { %367 = vst [vmem:[%s1757_s8 + $0x40] sm:$0xff] (!%p1028_p2), %v1482_v8  ;;  %368 = vst [vmem:[%s1757_s8 + $0x48] sm:$0xff] (!%p1028_p2), %v1482_v8 }
  0x92   : > { %369 = vst [vmem:[%s1757_s8 + $0x50] sm:$0xff] (!%p1028_p2), %v1482_v8  ;;  %370 = vst [vmem:[%s1757_s8 + $0x58] sm:$0xff] (!%p1028_p2), %v1482_v8 }
  0x93   : > { %371 = vst [vmem:[%s1757_s8 + $0x60] sm:$0xff] %v1482_v8  ;;  %372 = vst [vmem:[%s1757_s8 + $0x68] sm:$0xff] %v1482_v8 }
  0x94   : > { %373 = vst [vmem:[%s1757_s8 + $0x70] sm:$0xff] %v1482_v8  ;;  %374 = vst [vmem:[%s1757_s8 + $0x78] sm:$0xff] %v1482_v8 }
  0x95 PF: > { %v1258_v9 = vld [vmem:[%s1734_s29 + $0x40] sm:$0xff]   ;;  %v1260_v11 = vld [vmem:[%s1734_s29 + $0x48] sm:$0xff]   ;;  %v1262_v13 = vld [vmem:[%s1734_s29 + $0x50] sm:$0xff]   ;;  %p1045_p3 = scmp.ne.s32.totalorder %s1458_s23, 1 }
  0x96   : > { %v1259_v10 = vld [vmem:[%s1734_s29] sm:$0xff]   ;;  %1055 = vmatprep.subr.bf16.mxu0 %v1258_v9  ;;  %1119 = vmatprep.subr.bf16.mxu1 %v1258_v9  ;;  %v1261_v12 = vld [vmem:[%s1734_s29 + $0x8] sm:$0xff]   ;;  %v1263_v14 = vld [vmem:[%s1734_s29 + $0x10] sm:$0xff]  }
  0x97   : > { %1056 = vmatpush3.bf16.msra.mxu0 %v1259_v10  ;;  %1127 = vmatpush3.bf16.msra.mxu1 %v1259_v10  ;;  %v1264_v15 = vld [vmem:[%s1734_s29 + $0x58] sm:$0xff]   ;;  %v1266_v17 = vld [vmem:[%s1734_s29 + $0x60] sm:$0xff]   ;;  %v1268_v19 = vld [vmem:[%s1734_s29 + $0x68] sm:$0xff]  }
  0x98   : > { %1057 = vmatprep.subr.bf16.mxu0 %v1260_v11  ;;  %1120 = vmatprep.subr.bf16.mxu1 %v1260_v11  ;;  %v1265_v16 = vld [vmem:[%s1734_s29 + $0x18] sm:$0xff]   ;;  %v1267_v18 = vld [vmem:[%s1734_s29 + $0x20] sm:$0xff]   ;;  %v392_v20 = vld [vmem:[%s1732_s14 + $0x8] sm:$0xff] }
  0x99   : > { %v396_v21 = vld [vmem:[%s1732_s14 + $0x28] sm:$0xff]  ;;  %v400_v22 = vunpack.c.l.s8.bf16 %v392_v20  ;;  %v1270_v25 = vld [vmem:[%s1734_s29 + $0x70] sm:$0xff]   ;;  %v1272_v27 = vld [vmem:[%s1734_s29 + $0x78] sm:$0xff]   ;;  %v402_v33 = vunpack.c.h.s8.bf16 %v392_v20 }
  0x9a   : > { %v408_v23 = vunpack.c.l.s8.bf16 %v396_v21  ;;  %v1269_v24 = vld [vmem:[%s1734_s29 + $0x28] sm:$0xff]   ;;  %v1271_v26 = vld [vmem:[%s1734_s29 + $0x30] sm:$0xff]   ;;  %v1273_v28 = vld [vmem:[%s1734_s29 + $0x38] sm:$0xff]   ;;  %v410_v34 = vunpack.c.h.s8.bf16 %v396_v21 }
  0x9b   : > { %1058 = vmatpush3.bf16.msra.mxu0 %v1261_v12  ;;  %1128 = vmatpush3.bf16.msra.mxu1 %v1261_v12  ;;  %v391_v29 = vld [vmem:[%s1732_s14] sm:$0xff]  ;;  %v394_v35 = vld [vmem:[%s1732_s14 + $0x18] sm:$0xff]  ;;  %v393_v41 = vld [vmem:[%s1732_s14 + $0x10] sm:$0xff] }
  0x9c   : > { %1059 = vmatprep.subr.bf16.mxu0 %v1262_v13  ;;  %1121 = vmatprep.subr.bf16.mxu1 %v1262_v13  ;;  %v395_v30 = vld [vmem:[%s1732_s14 + $0x20] sm:$0xff]  ;;  %v399_v31 = vunpack.c.l.s8.bf16 %v391_v29  ;;  %v398_v36 = vld [vmem:[%s1732_s14 + $0x38] sm:$0xff]  ;;  %v401_v37 = vunpack.c.h.s8.bf16 %v391_v29  ;;  %v404_v39 = vunpack.c.l.s8.bf16 %v394_v35  ;;  %v397_v42 = vld [vmem:[%s1732_s14 + $0x30] sm:$0xff]  ;;  %v403_v43 = vunpack.c.l.s8.bf16 %v393_v41 }
  0x9d   : > { %575 = vmatprep.mubr.bf16.mxu0 %v400_v22  ;;  %607 = vmatprep.mubr.bf16.mxu1 %v408_v23  ;;  %v407_v32 = vunpack.c.l.s8.bf16 %v395_v30  ;;  %v409_v38 = vunpack.c.h.s8.bf16 %v395_v30  ;;  %v412_v40 = vunpack.c.l.s8.bf16 %v398_v36  ;;  %v411_v44 = vunpack.c.l.s8.bf16 %v397_v42  ;;  %v375_v51 = vld [vmem:[%s1757_s8] sm:$0xff]  ;;  %v376_v59 = vld [vmem:[%s1757_s8 + $0x8] sm:$0xff]  ;;  %v377_v7 = vld [vmem:[%s1757_s8 + $0x10] sm:$0xff] }
  0x9e   : > { %v406_v45 = vunpack.c.h.s8.bf16 %v394_v35  ;;  %v414_v46 = vunpack.c.h.s8.bf16 %v398_v36  ;;  %v405_v47 = vunpack.c.h.s8.bf16 %v393_v41  ;;  %v413_v48 = vunpack.c.h.s8.bf16 %v397_v42  ;;  %v383_v53 = vld [vmem:[%s1757_s8 + $0x40] sm:$0xff]  ;;  %v384_v61 = vld [vmem:[%s1757_s8 + $0x48] sm:$0xff]  ;;  %v385_v9 = vld [vmem:[%s1757_s8 + $0x50] sm:$0xff] }
  0x9f   : > { %1060 = vmatpush3.bf16.msra.mxu0 %v1263_v14  ;;  %1129 = vmatpush3.bf16.msra.mxu1 %v1263_v14  ;;  %v387_v29 = vld [vmem:[%s1757_s8 + $0x60] sm:$0xff]  ;;  %v380_v35 = vld [vmem:[%s1757_s8 + $0x28] sm:$0xff] }
  0xa0   : > { %1061 = vmatprep.subr.bf16.mxu0 %v1264_v15  ;;  %1122 = vmatprep.subr.bf16.mxu1 %v1264_v15  ;;  %v378_v15 = vld [vmem:[%s1757_s8 + $0x18] sm:$0xff] }
  0xa3   : > { %1062 = vmatpush3.bf16.msra.mxu0 %v1265_v16  ;;  %1130 = vmatpush3.bf16.msra.mxu1 %v1265_v16 }
  0xa4   : > { %1063 = vmatprep.subr.bf16.mxu0 %v1266_v17  ;;  %1123 = vmatprep.subr.bf16.mxu1 %v1266_v17  ;;  %v386_v17 = vld [vmem:[%s1757_s8 + $0x58] sm:$0xff] }
  0xa7   : > { %1064 = vmatpush3.bf16.msra.mxu0 %v1267_v18  ;;  %1131 = vmatpush3.bf16.msra.mxu1 %v1267_v18 }
  0xa8   : > { %1065 = vmatprep.subr.bf16.mxu0 %v1268_v19  ;;  %1124 = vmatprep.subr.bf16.mxu1 %v1268_v19 }
  0xab   : > { %1066 = vmatpush3.bf16.msra.mxu0 %v1269_v24  ;;  %1132 = vmatpush3.bf16.msra.mxu1 %v1269_v24 }
  0xac   : > { %1067 = vmatprep.subr.bf16.mxu0 %v1270_v25  ;;  %1125 = vmatprep.subr.bf16.mxu1 %v1270_v25 }
  0xaf   : > { %1068 = vmatpush3.bf16.msra.mxu0 %v1271_v26  ;;  %1133 = vmatpush3.bf16.msra.mxu1 %v1271_v26 }
  0xb0   : > { %1069 = vmatprep.subr.bf16.mxu0 %v1272_v27  ;;  %1126 = vmatprep.subr.bf16.mxu1 %v1272_v27  ;;  %v379_v27 = vld [vmem:[%s1757_s8 + $0x20] sm:$0xff] }
  0xb3   : > { %1070 = vmatpush3.bf16.msra.mxu0 %v1273_v28  ;;  %1134 = vmatpush3.bf16.msra.mxu1 %v1273_v28 }
  0xb6   : > { %576 = vmatmul.mubr.bf16.vlgmr.msra.gmra.mrb[0].mxu0 %v399_v31  ;;  %608 = vmatmul.mubr.bf16.vlgmr.msra.gmra.mrb[0].mxu1 %v407_v32 }
  0xb7   : > { %583 = vmatprep.mubr.bf16.mxu0 %v402_v33  ;;  %615 = vmatprep.mubr.bf16.mxu1 %v410_v34 }
  0xbe   : > { %584 = vmatmul.mubr.bf16.gmra.mrb[4].mxu0 %v401_v37  ;;  %616 = vmatmul.mubr.bf16.gmra.mrb[4].mxu1 %v409_v38  ;;  %v388_v37 = vld [vmem:[%s1757_s8 + $0x68] sm:$0xff] }
  0xbf   : > { %591 = vmatprep.mubr.bf16.mxu0 %v404_v39  ;;  %623 = vmatprep.mubr.bf16.mxu1 %v412_v40 }
  0xc6   : > { %592 = vmatmul.mubr.bf16.gmra.mrb[8].mxu0 %v403_v43  ;;  %624 = vmatmul.mubr.bf16.gmra.mrb[8].mxu1 %v411_v44 }
  0xc7   : > { %599 = vmatprep.mubr.bf16.mxu0 %v406_v45  ;;  %631 = vmatprep.mubr.bf16.mxu1 %v414_v46 }
  0xce   : > { %600 = vmatmul.mubr.bf16.gmra.mrb[12].mxu0 %v405_v47  ;;  %632 = vmatmul.mubr.bf16.gmra.mrb[12].mxu1 %v413_v48  ;;  %v381_v47 = vld [vmem:[%s1757_s8 + $0x30] sm:$0xff] }
 0x189   : > { %v1071_v49 = vpop.f32.mrb[0].mxu0  ;;  %v1095_v50 = vpop.f32.mrb[0].mxu1 }
 0x18a   : > { %v1072_v52 = vpop.f32.mrb[1].mxu0  ;;  %v1096_v54 = vpop.f32.mrb[1].mxu1 }
 0x18b   : > { %v1073_v55 = vadd.f32 %v1072_v52, %v1071_v49  ;;  %v1097_v56 = vadd.f32 %v1096_v54, %v1095_v50  ;;  %v1074_v57 = vpop.f32.mrb[2].mxu0  ;;  %v1098_v58 = vpop.f32.mrb[2].mxu1  ;;  %v389_v49 = vld [vmem:[%s1757_s8 + $0x70] sm:$0xff] }
 0x18c   : > { %v1075_v60 = vpop.f32.mrb[3].mxu0  ;;  %v1099_v62 = vpop.f32.mrb[3].mxu1 }
 0x18d   : > { %v640_v63 = vadd.f32 %v1073_v55, %v375_v51  ;;  %v648_v0 = vadd.f32 %v1097_v56, %v383_v53  ;;  %v1076_v1 = vadd.f32 %v1075_v60, %v1074_v57  ;;  %v1100_v2 = vadd.f32 %v1099_v62, %v1098_v58  ;;  %v382_v55 = vld [vmem:[%s1757_s8 + $0x38] sm:$0xff] }
 0x18e   : > { %v390_v57 = vld [vmem:[%s1757_s8 + $0x78] sm:$0xff] }
 0x18f   : > { %656 = vst [vmem:[%s1757_s8] sm:$0xff] %v640_v63  ;;  %664 = vst [vmem:[%s1757_s8 + $0x40] sm:$0xff] %v648_v0  ;;  %v641_v3 = vadd.f32 %v1076_v1, %v376_v59  ;;  %v649_v4 = vadd.f32 %v1100_v2, %v384_v61  ;;  %v694_v1 = vld [vmem:[%s1755_s0 + $0x10] sm:$0xff] (!%p1045_p3)  ;;  %v692_v2 = vld [vmem:[%s1755_s0] sm:$0xff] (!%p1045_p3) }
 0x191   : > { %657 = vst [vmem:[%s1757_s8 + $0x8] sm:$0xff] %v641_v3  ;;  %665 = vst [vmem:[%s1757_s8 + $0x48] sm:$0xff] %v649_v4  ;;  %v1077_v5 = vpop.f32.mrb[4].mxu0  ;;  %v1101_v6 = vpop.f32.mrb[4].mxu1  ;;  %v1483_v3 = vmov (!%p1045_p3), 0   ;;  %v695_v4 = vld [vmem:[%s1755_s0 + $0x18] sm:$0xff] (!%p1045_p3) }
 0x192   : > { %v1078_v8 = vpop.f32.mrb[5].mxu0  ;;  %v1102_v10 = vpop.f32.mrb[5].mxu1  ;;  %1275 = vset.pattern.permute.xlu1 (!%p1045_p3), %v1483_v3  ;;  %1274 = vset.pattern.permute.xlu0 (!%p1045_p3), %v1483_v3 }
 0x193   : > { %v1079_v11 = vadd.f32 %v1078_v8, %v1077_v5  ;;  %v1103_v12 = vadd.f32 %v1102_v10, %v1101_v6  ;;  %v1080_v13 = vpop.f32.mrb[6].mxu0  ;;  %v1104_v14 = vpop.f32.mrb[6].mxu1  ;;  %720 = vperm.xlu1 (!%p1045_p3), %1275, %v694_v1   ;;  %710 = vperm.xlu0 (!%p1045_p3), %1274, %v692_v2   ;;  %v693_v5 = vld [vmem:[%s1755_s0 + $0x8] sm:$0xff] (!%p1045_p3)  ;;  %v699_v8 = vld [vmem:[%s1755_s0 + $0x38] sm:$0xff] (!%p1045_p3) }
 0x194   : > { %v1081_v16 = vpop.f32.mrb[7].mxu0  ;;  %v1105_v18 = vpop.f32.mrb[7].mxu1  ;;  %v697_v6 = vld [vmem:[%s1755_s0 + $0x28] sm:$0xff] (!%p1045_p3) }
 0x195   : > { %v642_v19 = vadd.f32 %v1079_v11, %v377_v7  ;;  %v650_v20 = vadd.f32 %v1103_v12, %v385_v9  ;;  %v1082_v21 = vadd.f32 %v1081_v16, %v1080_v13  ;;  %v1106_v22 = vadd.f32 %v1105_v18, %v1104_v14  ;;  %v696_v7 = vld [vmem:[%s1755_s0 + $0x20] sm:$0xff] (!%p1045_p3)  ;;  %v698_v9 = vld [vmem:[%s1755_s0 + $0x30] sm:$0xff] (!%p1045_p3)  ;;  %v701_v10 = vld [vmem:[%s1755_s0 + $0x48] sm:$0xff] (!%p1045_p3) }
 0x196   : > { %v700_v11 = vld [vmem:[%s1755_s0 + $0x40] sm:$0xff] (!%p1045_p3)  ;;  %v703_v12 = vld [vmem:[%s1755_s0 + $0x58] sm:$0xff] (!%p1045_p3)  ;;  %v702_v13 = vld [vmem:[%s1755_s0 + $0x50] sm:$0xff] (!%p1045_p3) }
 0x197   : > { %658 = vst [vmem:[%s1757_s8 + $0x10] sm:$0xff] %v642_v19  ;;  %666 = vst [vmem:[%s1757_s8 + $0x50] sm:$0xff] %v650_v20  ;;  %v643_v23 = vadd.f32 %v1082_v21, %v378_v15  ;;  %v651_v24 = vadd.f32 %v1106_v22, %v386_v17  ;;  %725 = vperm.xlu1 (!%p1045_p3), %1275, %v695_v4   ;;  %715 = vperm.xlu0 (!%p1045_p3), %1274, %v693_v5   ;;  %v705_v14 = vld [vmem:[%s1755_s0 + $0x68] sm:$0xff] (!%p1045_p3)  ;;  %v704_v15 = vld [vmem:[%s1755_s0 + $0x60] sm:$0xff] (!%p1045_p3) }
 0x198   : > { %v707_v16 = vld [vmem:[%s1755_s0 + $0x78] sm:$0xff] (!%p1045_p3)  ;;  %v706_v17 = vld [vmem:[%s1755_s0 + $0x70] sm:$0xff] (!%p1045_p3)  ;;  %v676_v19 = vld [vmem:[%s1757_s8] sm:$0xff] (!%p1045_p3) }
 0x199   : > { %659 = vst [vmem:[%s1757_s8 + $0x18] sm:$0xff] %v643_v23  ;;  %667 = vst [vmem:[%s1757_s8 + $0x58] sm:$0xff] %v651_v24  ;;  %v1083_v25 = vpop.f32.mrb[8].mxu0  ;;  %v1107_v26 = vpop.f32.mrb[8].mxu1  ;;  %v806_v20 = vld [vmem:[%s1745_s5 + $0x10] sm:$0xff] (!%p1045_p3)  ;;  %v804_v22 = vld [vmem:[%s1745_s5] sm:$0xff] (!%p1045_p3) }
 0x19a   : > { %v1084_v28 = vpop.f32.mrb[9].mxu0  ;;  %v1108_v30 = vpop.f32.mrb[9].mxu1 }
 0x19b   : > { %v1085_v31 = vadd.f32 %v1084_v28, %v1083_v25  ;;  %v1109_v32 = vadd.f32 %v1108_v30, %v1107_v26  ;;  %v1086_v33 = vpop.f32.mrb[10].mxu0  ;;  %v1110_v34 = vpop.f32.mrb[10].mxu1  ;;  %735 = vperm.xlu1 (!%p1045_p3), %1275, %v697_v6   ;;  %730 = vperm.xlu0 (!%p1045_p3), %1274, %v696_v7   ;;  %v807_v30 = vld [vmem:[%s1745_s5 + $0x18] sm:$0xff] (!%p1045_p3) }
 0x19c   : > { %v1087_v36 = vpop.f32.mrb[11].mxu0  ;;  %v1111_v38 = vpop.f32.mrb[11].mxu1  ;;  %v815_v6 = vld [vmem:[%s1745_s5 + $0x58] sm:$0xff] (!%p1045_p3) }
 0x19d   : > { %v644_v39 = vadd.f32 %v1085_v31, %v379_v27  ;;  %v652_v40 = vadd.f32 %v1109_v32, %v387_v29  ;;  %v1088_v41 = vadd.f32 %v1087_v36, %v1086_v33  ;;  %v1112_v42 = vadd.f32 %v1111_v38, %v1110_v34  ;;  %v677_v27 = vld [vmem:[%s1757_s8 + $0x8] sm:$0xff] (!%p1045_p3) }
 0x19e   : > { %v678_v18 = vld [vmem:[%s1757_s8 + $0x10] sm:$0xff] (!%p1045_p3)  ;;  %v805_v32 = vld [vmem:[%s1745_s5 + $0x8] sm:$0xff] (!%p1045_p3) }
 0x19f   : > { %660 = vst [vmem:[%s1757_s8 + $0x20] sm:$0xff] %v644_v39  ;;  %668 = vst [vmem:[%s1757_s8 + $0x60] sm:$0xff] %v652_v40  ;;  %v645_v43 = vadd.f32 %v1088_v41, %v380_v35  ;;  %v653_v44 = vadd.f32 %v1112_v42, %v388_v37  ;;  %745 = vperm.xlu1 (!%p1045_p3), %1275, %v699_v8   ;;  %740 = vperm.xlu0 (!%p1045_p3), %1274, %v698_v9   ;;  %v809_v40 = vld [vmem:[%s1745_s5 + $0x28] sm:$0xff] (!%p1045_p3)  ;;  %v808_v42 = vld [vmem:[%s1745_s5 + $0x20] sm:$0xff] (!%p1045_p3) }
 0x1a0   : > { %v679_v26 = vld [vmem:[%s1757_s8 + $0x18] sm:$0xff] (!%p1045_p3)  ;;  %v686_v3 = vld [vmem:[%s1757_s8 + $0x50] sm:$0xff] (!%p1045_p3) }
 0x1a1   : > { %661 = vst [vmem:[%s1757_s8 + $0x28] sm:$0xff] %v645_v43  ;;  %669 = vst [vmem:[%s1757_s8 + $0x68] sm:$0xff] %v653_v44  ;;  %v1089_v45 = vpop.f32.mrb[12].mxu0  ;;  %v1113_v46 = vpop.f32.mrb[12].mxu1  ;;  %v687_v2 = vld [vmem:[%s1757_s8 + $0x58] sm:$0xff] (!%p1045_p3)  ;;  %v814_v8 = vld [vmem:[%s1745_s5 + $0x50] sm:$0xff] (!%p1045_p3) }
 0x1a2   : > { %v1090_v48 = vpop.f32.mrb[13].mxu0  ;;  %v1114_v50 = vpop.f32.mrb[13].mxu1 }
 0x1a3   : > { %v1091_v51 = vadd.f32 %v1090_v48, %v1089_v45  ;;  %v1115_v52 = vadd.f32 %v1114_v50, %v1113_v46  ;;  %v1092_v53 = vpop.f32.mrb[14].mxu0  ;;  %v1116_v54 = vpop.f32.mrb[14].mxu1  ;;  %675 = sbr.rel (%p1045_p3) target bundleno = 564 (0x234), region = 75  ;;  %755 = vperm.xlu1 (!%p1045_p3), %1275, %v701_v10   ;;  %750 = vperm.xlu0 (!%p1045_p3), %1274, %v700_v11   ;;  %v811_v50 = vld [vmem:[%s1745_s5 + $0x38] sm:$0xff] (!%p1045_p3) }
 0x1a4   : > { %v1093_v56 = vpop.f32.mrb[15].mxu0  ;;  %v1117_v58 = vpop.f32.mrb[15].mxu1 }
 0x1a5   : > { %v646_v59 = vadd.f32 %v1091_v51, %v381_v47  ;;  %v654_v60 = vadd.f32 %v1115_v52, %v389_v49  ;;  %v1094_v61 = vadd.f32 %v1093_v56, %v1092_v53  ;;  %v1118_v62 = vadd.f32 %v1117_v58, %v1116_v54  ;;  %v810_v52 = vld [vmem:[%s1745_s5 + $0x30] sm:$0xff] (!%p1045_p3)  ;;  %v685_v56 = vld [vmem:[%s1757_s8 + $0x48] sm:$0xff] (!%p1045_p3) }
 0x1a6   : > { %v680_v37 = vld [vmem:[%s1757_s8 + $0x20] sm:$0xff] (!%p1045_p3) }
 0x1a7   : > { %662 = vst [vmem:[%s1757_s8 + $0x30] sm:$0xff] %v646_v59  ;;  %670 = vst [vmem:[%s1757_s8 + $0x70] sm:$0xff] %v654_v60  ;;  %v647_v63 = vadd.f32 %v1094_v61, %v382_v55  ;;  %v655_v0 = vadd.f32 %v1118_v62, %v390_v57  ;;  %765 = vperm.xlu1 (!%p1045_p3), %1275, %v703_v12   ;;  %760 = vperm.xlu0 (!%p1045_p3), %1274, %v702_v13   ;;  %v684_v57 = vld [vmem:[%s1757_s8 + $0x40] sm:$0xff] (!%p1045_p3)  ;;  %v813_v60 = vld [vmem:[%s1745_s5 + $0x48] sm:$0xff] (!%p1045_p3) }
 0x1a8   : > { %v681_v36 = vld [vmem:[%s1757_s8 + $0x28] sm:$0xff] (!%p1045_p3)  ;;  %v812_v62 = vld [vmem:[%s1745_s5 + $0x40] sm:$0xff] (!%p1045_p3) }
 0x1a9   : > { %663 = vst [vmem:[%s1757_s8 + $0x38] sm:$0xff] %v647_v63  ;;  %671 = vst [vmem:[%s1757_s8 + $0x78] sm:$0xff] %v655_v0  ;;  %v689_v12 = vld [vmem:[%s1757_s8 + $0x68] sm:$0xff] (!%p1045_p3)  ;;  %v688_v13 = vld [vmem:[%s1757_s8 + $0x60] sm:$0xff] (!%p1045_p3) }
 0x1ab   : > { %775 = vperm.xlu1 %1275, %v705_v14   ;;  %770 = vperm.xlu0 %1274, %v704_v15  }
 0x1ae   : > { %v682_v47 = vld [vmem:[%s1757_s8 + $0x30] sm:$0xff] }
 0x1af   : > { %785 = vperm.xlu1 %1275, %v707_v16   ;;  %780 = vperm.xlu0 %1274, %v706_v17   ;;  %v817_v16 = vld [vmem:[%s1745_s5 + $0x68] sm:$0xff] }
 0x1b0   : > { %v683_v46 = vld [vmem:[%s1757_s8 + $0x38] sm:$0xff] }
 0x212   : > { %v721_v21 = vpop.permute.xlu1 %720  ;;  %v711_v23 = vpop.permute.xlu0 %710 }
 0x213   : > { %v790_v24 = vmul.f32 %v721_v21, %v678_v18  ;;  %v788_v25 = vmul.f32 %v711_v23, %v676_v19  ;;  %v816_v18 = vld [vmem:[%s1745_s5 + $0x60] sm:$0xff]  ;;  %v690_v23 = vld [vmem:[%s1757_s8 + $0x70] sm:$0xff] }
 0x215   : > { %v822_v28 = vadd.f32 %v806_v20, %v790_v24  ;;  %v820_v29 = vadd.f32 %v804_v22, %v788_v25  ;;  %v691_v22 = vld [vmem:[%s1757_s8 + $0x78] sm:$0xff] }
 0x216   : > { %v726_v31 = vpop.permute.xlu1 %725  ;;  %v716_v33 = vpop.permute.xlu0 %715 }
 0x217   : > { %838 = vst [vmem:[%s1757_s8 + $0x10] sm:$0xff] %v822_v28  ;;  %836 = vst [vmem:[%s1757_s8] sm:$0xff] %v820_v29  ;;  %v791_v34 = vmul.f32 %v726_v31, %v679_v26  ;;  %v789_v35 = vmul.f32 %v716_v33, %v677_v27  ;;  %v819_v26 = vld [vmem:[%s1745_s5 + $0x78] sm:$0xff]  ;;  %v818_v28 = vld [vmem:[%s1745_s5 + $0x70] sm:$0xff] }
 0x219   : > { %v823_v38 = vadd.f32 %v807_v30, %v791_v34  ;;  %v821_v39 = vadd.f32 %v805_v32, %v789_v35 }
 0x21a   : > { %v736_v41 = vpop.permute.xlu1 %735  ;;  %v731_v43 = vpop.permute.xlu0 %730 }
 0x21b   : > { %839 = vst [vmem:[%s1757_s8 + $0x18] sm:$0xff] %v823_v38  ;;  %837 = vst [vmem:[%s1757_s8 + $0x8] sm:$0xff] %v821_v39  ;;  %v793_v44 = vmul.f32 %v736_v41, %v681_v36  ;;  %v792_v45 = vmul.f32 %v731_v43, %v680_v37 }
 0x21d   : > { %v825_v48 = vadd.f32 %v809_v40, %v793_v44  ;;  %v824_v49 = vadd.f32 %v808_v42, %v792_v45 }
 0x21e   : > { %v746_v51 = vpop.permute.xlu1 %745  ;;  %v741_v53 = vpop.permute.xlu0 %740 }
 0x21f   : > { %841 = vst [vmem:[%s1757_s8 + $0x28] sm:$0xff] %v825_v48  ;;  %840 = vst [vmem:[%s1757_s8 + $0x20] sm:$0xff] %v824_v49  ;;  %v795_v54 = vmul.f32 %v746_v51, %v683_v46  ;;  %v794_v55 = vmul.f32 %v741_v53, %v682_v47 }
 0x221   : > { %v827_v58 = vadd.f32 %v811_v50, %v795_v54  ;;  %v826_v59 = vadd.f32 %v810_v52, %v794_v55 }
 0x222   : > { %v756_v61 = vpop.permute.xlu1 %755  ;;  %v751_v63 = vpop.permute.xlu0 %750 }
 0x223   : > { %843 = vst [vmem:[%s1757_s8 + $0x38] sm:$0xff] %v827_v58  ;;  %842 = vst [vmem:[%s1757_s8 + $0x30] sm:$0xff] %v826_v59  ;;  %v797_v0 = vmul.f32 %v756_v61, %v685_v56  ;;  %v796_v1 = vmul.f32 %v751_v63, %v684_v57 }
 0x225   : > { %v829_v4 = vadd.f32 %v813_v60, %v797_v0  ;;  %v828_v5 = vadd.f32 %v812_v62, %v796_v1 }
 0x226   : > { %v766_v7 = vpop.permute.xlu1 %765  ;;  %v761_v9 = vpop.permute.xlu0 %760 }
 0x227   : > { %845 = vst [vmem:[%s1757_s8 + $0x48] sm:$0xff] %v829_v4  ;;  %844 = vst [vmem:[%s1757_s8 + $0x40] sm:$0xff] %v828_v5  ;;  %v799_v10 = vmul.f32 %v766_v7, %v687_v2  ;;  %v798_v11 = vmul.f32 %v761_v9, %v686_v3 }
 0x229   : > { %v831_v14 = vadd.f32 %v815_v6, %v799_v10  ;;  %v830_v15 = vadd.f32 %v814_v8, %v798_v11 }
 0x22a   : > { %v776_v17 = vpop.permute.xlu1 %775  ;;  %v771_v19 = vpop.permute.xlu0 %770 }
 0x22b   : > { %847 = vst [vmem:[%s1757_s8 + $0x58] sm:$0xff] %v831_v14  ;;  %846 = vst [vmem:[%s1757_s8 + $0x50] sm:$0xff] %v830_v15  ;;  %v801_v20 = vmul.f32 %v776_v17, %v689_v12  ;;  %v800_v21 = vmul.f32 %v771_v19, %v688_v13 }
 0x22d   : > { %v833_v24 = vadd.f32 %v817_v16, %v801_v20  ;;  %v832_v25 = vadd.f32 %v816_v18, %v800_v21 }
 0x22e   : > { %v786_v27 = vpop.permute.xlu1 %785  ;;  %v781_v29 = vpop.permute.xlu0 %780 }
 0x22f   : > { %849 = vst [vmem:[%s1757_s8 + $0x68] sm:$0xff] %v833_v24  ;;  %848 = vst [vmem:[%s1757_s8 + $0x60] sm:$0xff] %v832_v25  ;;  %v803_v30 = vmul.f32 %v786_v27, %v691_v22  ;;  %v802_v31 = vmul.f32 %v781_v29, %v690_v23 }
 0x231   : > { %v835_v32 = vadd.f32 %v819_v26, %v803_v30  ;;  %v834_v33 = vadd.f32 %v818_v28, %v802_v31 }
 0x233   : > { %851 = vst [vmem:[%s1757_s8 + $0x78] sm:$0xff] %v835_v32  ;;  %850 = vst [vmem:[%s1757_s8 + $0x70] sm:$0xff] %v834_v33 }
 0x234 PF: > { %s1054_s23 = sshll.u32 %s1462_s24, 11  ;;  %s2016_s12 = sld [smem:[#allocation22_spill]] }
 0x235   : > { %s866_s4 = sshll.u32 %s1757_s8, 4  ;;  %s853_s11 = scalar_lea.sflag [#allocation5], %s1741_s1  ;;  %s1904_s4 = int_to_ptr.vmem [resolvable:$true] %s866_s4 }
 0x236   : > { %s1332_s14 = scalar_lea.vmem %s1904_s4, 2048  ;;  %p2017_p13 = scmp.ne.s32.totalorder %s2009_s7, 0 }
 0x237   : > { %p1333_p10 = scmp.ne.s32.totalorder %s1904_s4, %s1332_s14  ;;  %s1484_s18 = smov [#allocation8]  }
 0x238   : > { %s1336_s29 = sshll.u32 %s1484_s18, 4  ;;  %s1337_s29 = int_to_ptr.vmem [resolvable:$false] %s1336_s29 }
 0x239   : > { %p1334_p1 = pnand %p1333_p10, %p2017_p13  ;;  %s1338_s24 = scalar_lea.vmem %s1337_s29, 4096 }
 0x23a   : > { %s1901_s28 = scalar_lea.hbm %s2016_s12, %s1054_s23  ;;  %p1339_p12 = scmp.lt.s32.totalorder %s1904_s4, %s1337_s29 }
 0x23b   : > { %p1335_p7 = pneg %p1334_p1  ;;  %p1340_p8 = scmp.lt.s32.totalorder %s1338_s24, %s1332_s14 }
 0x23d   : > { %p1341_p6 = por %p1340_p8, %p1339_p12 }
 0x23f   : > { %p1342_p9 = pnand %p1341_p6, %p1335_p7 }
 0x241   : > { %1345 = shalt.err (!%p1342_p9)
}
 0x242   : > { %s1346_s21 = scalar_lea.hbm %s1901_s28, 2048  ;;  %s1350_s15 = scalar_lea.hbm %s2016_s12, 6144 }
 0x243   : > { %p1347_p11 = scmp.ne.s32.totalorder %s1901_s28, %s1346_s21  ;;  %p1351_p5 = scmp.lt.u32.totalorder %s1901_s28, %s2016_s12 }
 0x244   : > { %p1352_p2 = scmp.lt.u32.totalorder %s1350_s15, %s1346_s21  ;;  %p1354_p10 = scmp.lt.u32.totalorder %s1346_s21, %s1901_s28 }
 0x245   : > { %p1348_p0 = pnand %p1347_p11, %p2017_p13 }
 0x246   : > { %p1353_p3 = por %p1352_p2, %p1351_p5 }
 0x247   : > { %p1349_p4 = pneg %p1348_p0 }
 0x248   : > { %p1355_p1 = por %p1354_p10, %p1353_p3 }
 0x24a   : > { %p1356_p7 = pnand %p1355_p1, %p1349_p4 }
 0x24c   : > { %1359 = shalt.err (!%p1356_p7)
}
 0x24d   : > { %s1485_s9 = smov 128   ;;  %s1486_s0 = smov 8  }
 0x24e   : > { %1139 = dma.vmem_to_hbm [thread:$0]  (%p2017_p13), %s1904_s4, 2048, %s1901_s28, %s853_s11, %s1485_s9, %s1485_s9, %s1486_s0  }
 0x24f PF: > { %s2018_s8 = sld [smem:[#allocation12_spill]]  ;;  %s2019_s23 = sld [smem:[#allocation19_spill]] }
 0x250   : > { %p1145_p12 = scmp.ge.s32.totalorder %s1474_s27, 2 }
 0x255   : > { %s881_s6 = sand.u32 1, %s2018_s8   ;;  %p2020_p8 = scmp.ne.s32.totalorder %s2019_s23, 0 }
 0x256   : > { %s882_s13 = scalar_lea.sflag [#allocation5], %s881_s6 }
 0x257   : > { %p1142_p6 = pnand %p1145_p12, %p2020_p8 }
 0x259   : > { %1421 = dma.done.wait (!%p1142_p6), %s882_s13, 2048  }
 0x25a   : > { %1423 = vsyncadd (!%p1142_p6), %s882_s13, 4294965248  ;;  %s23_s27 = sadd.s32 1, %s1474_s27   ;;  %s2022_s7 = sld [smem:[#allocation18_spill]] }
 0x25b   : > { %p1935_p9 = scmp.ge.s32.totalorder %s23_s27, 8   ;;  %s2023_s1 = sld [smem:[#allocation16_spill]] }
 0x25c   : > { %s2024_s28 = sld [smem:[#allocation17_spill]]  ;;  %s2025_s23 = sld [smem:[#allocation13_spill]] }
 0x25d   : > { %s2026_s25 = sld [smem:[#allocation14_spill]]  ;;  %s2027_s4 = sld [smem:[#allocation15_spill]] }
 0x25e   : > { %s2028_s15 = smov %s1430_s16  ;;  %s2029_s16 = smov %s1434_s17 }
 0x25f   : > { %s2031_s18 = smov %s1442_s19  ;;  %s2032_s19 = smov %s1446_s20 }
 0x260   : > { %s2030_s17 = smov %s2022_s7  ;;  %s2034_s21 = smov %s1454_s22 }
 0x261   : > { %s2033_s20 = smov %s2023_s1  ;;  %s2036_s24 = smov %s1470_s26 }
 0x262   : > { %s2035_s22 = smov %s2024_s28  ;;  %22 = sbr.rel (!%p1935_p9) target bundleno = 16 (0x10), region = 136 }
 0x263   : > { %s2037_s26 = smov %s2027_s4 }
 0x269   :  { %887 = vsyncpa [#allocation4], 1 }
 0x26a   :  { %889 = vsyncpa [#allocation4 + $0x1], 1 }
 0x26b   :  { %890 = vsyncpa [#allocation7], 1 }
 0x26c   :  { %892 = vsyncpa [#allocation7 + $0x1], 1 }
 0x26d   :  { %893 = vsyncpa [#allocation5], 1 }
 0x26e   :  { %895 = vsyncpa [#allocation5 + $0x1], 1 }

</bundles_post_ra>
